<compile_context>
chip_gen: v7x
topology: tpu7x:2x2x1
jax: 0.10.0
libtpu: 0.0.40
codegen_flags: <defaults>
</compile_context>

<pallas_src>
import functools

import jax
import jax.numpy as jnp
from jax import lax
from jax.experimental import pallas as pl
from jax.experimental.pallas import tpu as pltpu


# ------------------------------ Pallas kernel -------------------------------

def _fused_net_kernel(pT_ref, cw_ref, cb_ref, w1r_ref, b1_ref, w2_ref, b2_ref,
                      o_ref):
    """Per batch row: relu(cw @ patches^T + cb) -> f1(+relu) -> f2, lane-dense out.

    pT_ref : (tb, CKK, P)      f32   im2col patches, features x positions
    cw_ref : (O, CKK)          f32   conv weight, (c, kh, kw) flattened
    cb_ref : (O, 1)            f32
    w1r_ref: (O, P, 128)       bf16  w1.T reshaped (rows ordered o-major, = PyTorch flatten)
    b1_ref : (1, 128)          f32
    w2_ref : (128, 128)        bf16  w2.T zero-padded
    b2_ref : (1, 128)          f32
    o_ref  : (tb, 128)         f32
    """
    tb = pT_ref.shape[0]
    n_oc = w1r_ref.shape[0]
    fc_dtype = w1r_ref.dtype

    h1_rows = []
    for b in range(tb):                       # static unroll, tb is small
        # Conv as one small dense matmul (f32): (O, CKK) @ (CKK, P) -> (O, P).
        s = jnp.dot(cw_ref[...], pT_ref[b], preferred_element_type=jnp.float32)
        h0 = jnp.maximum(s + cb_ref[...], 0.0)            # (O, P) f32, ReLU
        h0 = h0.astype(fc_dtype)
        # f1: h1[j] = b1[j] + sum_o sum_p h0[o, p] * w1[j, o*P + p]
        acc = b1_ref[...]                                  # (1, 128) f32
        for o in range(n_oc):                              # static unroll, O=8
            acc = acc + jnp.dot(h0[o:o + 1, :], w1r_ref[o],
                                preferred_element_type=jnp.float32)
        h1_rows.append(jnp.maximum(acc, 0.0))              # (1, 128) f32
    h1 = jnp.concatenate(h1_rows, axis=0).astype(fc_dtype)  # (tb, 128)

    # f2 (padded to 128 lanes -> single unmasked store).
    out = jnp.dot(h1, w2_ref[...], preferred_element_type=jnp.float32)
    o_ref[...] = (out + b2_ref[...]).astype(o_ref.dtype)


# ---------------------------- One-time param prep ---------------------------

def prepare_params(params, *, oh, ow, hidden_pad=128, out_pad=128,
                   fc_dtype=jnp.bfloat16):
    """Pre-lay-out all weights once so the per-call path has no weight ops."""
    cw, cb, w1, b1, w2, b2 = (params[k] for k in ("cw", "cb", "w1", "b1",
                                                  "w2", "b2"))
    O, C, KH, KW = cw.shape
    P = oh * ow
    CKK = C * KH * KW
    hidden = w1.shape[0]       # 12
    action = w2.shape[0]       # 6
    assert w1.shape[1] == O * P

    # Conv weight flattened per out-channel in (c, kh, kw) order (PyTorch).
    cw_flat = cw.reshape(O, CKK).astype(jnp.float32)       # (8, 36)
    cb_col = cb.reshape(O, 1).astype(jnp.float32)          # (8, 1)

    # w1.T rows are ordered (o, p) (PyTorch flatten); view as (O, P, hidden)
    # and zero-pad hidden -> 128.  Padding is inert (zero weight columns).
    w1r = w1.T.reshape(O, P, hidden)
    w1r = jnp.pad(w1r, ((0, 0), (0, 0), (0, hidden_pad - hidden)))
    b1p = jnp.zeros((1, hidden_pad), jnp.float32).at[0, :hidden].set(b1)

    # f2: pad to a lane-dense (128, 128) weight and (1, 128) bias.
    w2p = jnp.zeros((hidden_pad, out_pad), jnp.float32).at[:hidden, :action].set(w2.T)
    b2p = jnp.zeros((1, out_pad), jnp.float32).at[0, :action].set(b2)

    return dict(
        cw_flat=cw_flat,                   # (8, 36)     f32
        cb_col=cb_col,                     # (8, 1)      f32
        w1r=w1r.astype(fc_dtype),          # (8, 49, 128) bf16  (~100 KiB)
        b1p=b1p,                           # (1, 128)    f32
        w2p=w2p.astype(fc_dtype),          # (128, 128)  bf16
        b2p=b2p,                           # (1, 128)    f32
    )


# ------------------------------ Forward wrapper ------------------------------

@functools.partial(jax.jit, static_argnames=("kernel_size", "stride", "n_actions"))
def net_forward(x, prepped, *, kernel_size, stride, n_actions):
    """Forward pass equivalent to Net.forward for NCHW input x."""
    cw_flat = prepped["cw_flat"]
    cb_col = prepped["cb_col"]
    w1r = prepped["w1r"]
    b1p = prepped["b1p"]
    w2p = prepped["w2p"]
    b2p = prepped["b2p"]

    B = x.shape[0]
    # im2col in one XLA op, output (B, C*KH*KW, OH, OW); feature order (c,kh,kw)
    # matches the PyTorch conv-weight flatten.  No pad / cast round trips.
    patches = lax.conv_general_dilated_patches(
        x, (kernel_size, kernel_size), (stride, stride), "VALID",
        dimension_numbers=("NCHW", "OIHW", "NCHW"))
    CKK = patches.shape[1]
    P = patches.shape[2] * patches.shape[3]
    pT = patches.reshape(B, CKK, P)                        # (B, 36, 49) f32

    tb = B if B <= 8 else 8                                # B=2 -> single grid step
    grid = (pl.cdiv(B, tb),)
    n_pad = w2p.shape[1]

    out_padded = pl.pallas_call(
        _fused_net_kernel,
        out_shape=jax.ShapeDtypeStruct((B, n_pad), jnp.float32),
        grid=grid,
        in_specs=[
            pl.BlockSpec((tb, CKK, P), lambda i: (i, 0, 0)),
            pl.BlockSpec(cw_flat.shape, lambda i: (0, 0)),
            pl.BlockSpec(cb_col.shape, lambda i: (0, 0)),
            pl.BlockSpec(w1r.shape, lambda i: (0, 0, 0)),
            pl.BlockSpec(b1p.shape, lambda i: (0, 0)),
            pl.BlockSpec(w2p.shape, lambda i: (0, 0)),
            pl.BlockSpec(b2p.shape, lambda i: (0, 0)),
        ],
        out_specs=pl.BlockSpec((tb, n_pad), lambda i: (i, 0)),
        compiler_params=pltpu.CompilerParams(
            dimension_semantics=("parallel",)),
    )(pT, cw_flat, cb_col, w1r, b1p, w2p, b2p)

    return out_padded[:, :n_actions]


# -------------------------- Reference & param init ---------------------------

def net_reference(x, params, *, kernel_size, stride):
    """Pure-JAX reference identical to the PyTorch forward (f32)."""
    cw, cb, w1, b1, w2, b2 = (params[k] for k in ("cw", "cb", "w1", "b1",
                                                  "w2", "b2"))
    y = lax.conv_general_dilated(x, cw, (stride, stride), "VALID",
                                 dimension_numbers=("NCHW", "OIHW", "NCHW"))
    y = jnp.maximum(y + cb[None, :, None, None], 0.0)
    y = y.reshape(x.shape[0], -1)
    y = jnp.maximum(y @ w1.T + b1, 0.0)
    return y @ w2.T + b2


def init_params(key, in_channels, out_channels, middle, kernel_size,
                action_space=6):
    """Deterministic synthetic params with the same shapes as the PyTorch module."""
    k = jax.random.split(key, 6)
    fan_in_c = in_channels * kernel_size * kernel_size
    cw = jax.random.uniform(k[0], (out_channels, in_channels, kernel_size, kernel_size),
                            jnp.float32, -1.0, 1.0) / jnp.sqrt(fan_in_c)
    cb = jax.random.uniform(k[1], (out_channels,), jnp.float32, -1.0, 1.0) / jnp.sqrt(fan_in_c)
    w1 = 0.1 * jax.random.normal(k[2], (12, middle), jnp.float32)
    b1 = jax.random.uniform(k[3], (12,), jnp.float32, -1.0, 1.0) / jnp.sqrt(middle)
    w2 = 0.1 * jax.random.normal(k[4], (action_space, 12), jnp.float32)
    b2 = jax.random.uniform(k[5], (action_space,), jnp.float32, -1.0, 1.0) / jnp.sqrt(12)
    return dict(cw=cw, cb=cb, w1=w1, b1=b1, w2=w2, b2=b2)


if __name__ == "__main__":
    # batch=2, in_channels=4, 16x16 board, out_channels=8, kernel=3, stride=2
    # -> OH=OW=7 -> middle = 8*7*7 = 392, action_space = 6.
    B, C, H, W = 2, 4, 16, 16
    OUT_C, KS, STRIDE = 8, 3, 2
    OH = (H - KS) // STRIDE + 1
    OW = (W - KS) // STRIDE + 1
    MIDDLE = OUT_C * OH * OW
    ACTIONS = 6

    key = jax.random.PRNGKey(0)
    kx, kp = jax.random.split(key)
    x = jax.random.normal(kx, (B, C, H, W), jnp.float32)
    params = init_params(kp, C, OUT_C, MIDDLE, KS, ACTIONS)
    prepped = prepare_params(params, oh=OH, ow=OW)       # one-time weight layout

    action = net_forward(x, prepped, kernel_size=KS, stride=STRIDE,
                         n_actions=ACTIONS)
    action = jax.block_until_ready(action)
    assert action.shape == (B, ACTIONS) and action.dtype == jnp.float32

    # Numerical self-check against the pure-JAX (f32) reference (also verifies
    # the im2col feature ordering).  Conv is f32 in-kernel; only f1/f2 use bf16
    # operands with f32 accumulation, so typical max error is ~1e-3.
    ref = net_reference(x, params, kernel_size=KS, stride=STRIDE)
    if not bool(jnp.allclose(action, ref, rtol=5e-2, atol=5e-2)):
        raise AssertionError(
            f"mismatch vs reference, max abs err = {float(jnp.max(jnp.abs(action - ref)))}")
    print("KERNEL_OK")
</pallas_src>

<mosaic_0001>
module attributes {stable_mosaic.version = 11 : i64} {
  func.func @_fused_net_kernel(%arg0: i32, %arg1: memref<2x36x49xf32, #tpu.memory_space<vmem>>, %arg2: memref<8x36xf32, #tpu.memory_space<vmem>>, %arg3: memref<8x1xf32, #tpu.memory_space<vmem>>, %arg4: memref<8x49x128xbf16, #tpu.memory_space<vmem>>, %arg5: memref<1x128xf32, #tpu.memory_space<vmem>>, %arg6: memref<128x128xbf16, #tpu.memory_space<vmem>>, %arg7: memref<1x128xf32, #tpu.memory_space<vmem>>, %arg8: memref<2x128xf32, #tpu.memory_space<vmem>>) attributes {dimension_semantics = [#tpu.dimension_semantics<parallel>], iteration_bounds = array<i64: 1>, scalar_prefetch = 0 : i64, scratch_operands = 0 : i64, tpu.core_type = #tpu.core_type<tc>, window_params = [{transform_indices = @transform_0, window_bounds = array<i64: 2, 36, 49>}, {pipeline_mode = #tpu.pipeline_mode<synchronous>, transform_indices = @transform_1, window_bounds = array<i64: 8, 36>}, {pipeline_mode = #tpu.pipeline_mode<synchronous>, transform_indices = @transform_2, window_bounds = array<i64: 8, 1>}, {pipeline_mode = #tpu.pipeline_mode<synchronous>, transform_indices = @transform_3, window_bounds = array<i64: 8, 49, 128>}, {pipeline_mode = #tpu.pipeline_mode<synchronous>, transform_indices = @transform_4, window_bounds = array<i64: 1, 128>}, {pipeline_mode = #tpu.pipeline_mode<synchronous>, transform_indices = @transform_5, window_bounds = array<i64: 128, 128>}, {pipeline_mode = #tpu.pipeline_mode<synchronous>, transform_indices = @transform_6, window_bounds = array<i64: 1, 128>}, {transform_indices = @transform_7, window_bounds = array<i64: 2, 128>}]} {
    %c0 = arith.constant 0 : index
    %c0_0 = arith.constant 0 : index
    %0 = vector.load %arg2[%c0, %c0_0] : memref<8x36xf32, #tpu.memory_space<vmem>>, vector<8x36xf32>
    %c0_1 = arith.constant 0 : index
    %c0_2 = arith.constant 0 : index
    %c0_3 = arith.constant 0 : index
    %1 = vector.load %arg1[%c0_1, %c0_2, %c0_3] : memref<2x36x49xf32, #tpu.memory_space<vmem>>, vector<1x36x49xf32>
    %2 = vector.shape_cast %1 : vector<1x36x49xf32> to vector<36x49xf32>
    %cst = arith.constant dense<0.000000e+00> : vector<8x49xf32>
    %3 = tpu.matmul %0, %2, %cst {dimension_numbers = #tpu.dot_dimension_numbers<[1], [0], [0], [1], [0, 0, 1, 1], [], []>} : vector<8x36xf32>, vector<36x49xf32>, vector<8x49xf32> -> vector<8x49xf32>
    %c0_4 = arith.constant 0 : index
    %c0_5 = arith.constant 0 : index
    %4 = vector.load %arg3[%c0_4, %c0_5] : memref<8x1xf32, #tpu.memory_space<vmem>>, vector<8x1xf32>
    %5 = vector.broadcast %4 : vector<8x1xf32> to vector<8x49xf32>
    %6 = arith.addf %3, %5 : vector<8x49xf32>
    %cst_6 = arith.constant 0.000000e+00 : f32
    %7 = vector.broadcast %cst_6 : f32 to vector<8x49xf32>
    %8 = arith.maximumf %6, %7 : vector<8x49xf32>
    %9 = arith.truncf %8 : vector<8x49xf32> to vector<8x49xbf16>
    %c0_7 = arith.constant 0 : index
    %c0_8 = arith.constant 0 : index
    %10 = vector.load %arg5[%c0_7, %c0_8] : memref<1x128xf32, #tpu.memory_space<vmem>>, vector<1x128xf32>
    %11 = vector.extract_strided_slice %9 {offsets = [0, 0], sizes = [1, 49], strides = [1, 1]} : vector<8x49xbf16> to vector<1x49xbf16>
    %c0_9 = arith.constant 0 : index
    %c0_10 = arith.constant 0 : index
    %c0_11 = arith.constant 0 : index
    %12 = vector.load %arg4[%c0_9, %c0_10, %c0_11] : memref<8x49x128xbf16, #tpu.memory_space<vmem>>, vector<1x49x128xbf16>
    %13 = vector.shape_cast %12 : vector<1x49x128xbf16> to vector<49x128xbf16>
    %cst_12 = arith.constant dense<0.000000e+00> : vector<1x128xf32>
    %14 = tpu.matmul %11, %13, %cst_12 {dimension_numbers = #tpu.dot_dimension_numbers<[1], [0], [0], [1], [0, 0, 1, 1], [], []>} : vector<1x49xbf16>, vector<49x128xbf16>, vector<1x128xf32> -> vector<1x128xf32>
    %15 = arith.addf %10, %14 : vector<1x128xf32>
    %16 = vector.extract_strided_slice %9 {offsets = [1, 0], sizes = [1, 49], strides = [1, 1]} : vector<8x49xbf16> to vector<1x49xbf16>
    %c1 = arith.constant 1 : index
    %c0_13 = arith.constant 0 : index
    %c0_14 = arith.constant 0 : index
    %17 = vector.load %arg4[%c1, %c0_13, %c0_14] : memref<8x49x128xbf16, #tpu.memory_space<vmem>>, vector<1x49x128xbf16>
    %18 = vector.shape_cast %17 : vector<1x49x128xbf16> to vector<49x128xbf16>
    %cst_15 = arith.constant dense<0.000000e+00> : vector<1x128xf32>
    %19 = tpu.matmul %16, %18, %cst_15 {dimension_numbers = #tpu.dot_dimension_numbers<[1], [0], [0], [1], [0, 0, 1, 1], [], []>} : vector<1x49xbf16>, vector<49x128xbf16>, vector<1x128xf32> -> vector<1x128xf32>
    %20 = arith.addf %15, %19 : vector<1x128xf32>
    %21 = vector.extract_strided_slice %9 {offsets = [2, 0], sizes = [1, 49], strides = [1, 1]} : vector<8x49xbf16> to vector<1x49xbf16>
    %c2 = arith.constant 2 : index
    %c0_16 = arith.constant 0 : index
    %c0_17 = arith.constant 0 : index
    %22 = vector.load %arg4[%c2, %c0_16, %c0_17] : memref<8x49x128xbf16, #tpu.memory_space<vmem>>, vector<1x49x128xbf16>
    %23 = vector.shape_cast %22 : vector<1x49x128xbf16> to vector<49x128xbf16>
    %cst_18 = arith.constant dense<0.000000e+00> : vector<1x128xf32>
    %24 = tpu.matmul %21, %23, %cst_18 {dimension_numbers = #tpu.dot_dimension_numbers<[1], [0], [0], [1], [0, 0, 1, 1], [], []>} : vector<1x49xbf16>, vector<49x128xbf16>, vector<1x128xf32> -> vector<1x128xf32>
    %25 = arith.addf %20, %24 : vector<1x128xf32>
    %26 = vector.extract_strided_slice %9 {offsets = [3, 0], sizes = [1, 49], strides = [1, 1]} : vector<8x49xbf16> to vector<1x49xbf16>
    %c3 = arith.constant 3 : index
    %c0_19 = arith.constant 0 : index
    %c0_20 = arith.constant 0 : index
    %27 = vector.load %arg4[%c3, %c0_19, %c0_20] : memref<8x49x128xbf16, #tpu.memory_space<vmem>>, vector<1x49x128xbf16>
    %28 = vector.shape_cast %27 : vector<1x49x128xbf16> to vector<49x128xbf16>
    %cst_21 = arith.constant dense<0.000000e+00> : vector<1x128xf32>
    %29 = tpu.matmul %26, %28, %cst_21 {dimension_numbers = #tpu.dot_dimension_numbers<[1], [0], [0], [1], [0, 0, 1, 1], [], []>} : vector<1x49xbf16>, vector<49x128xbf16>, vector<1x128xf32> -> vector<1x128xf32>
    %30 = arith.addf %25, %29 : vector<1x128xf32>
    %31 = vector.extract_strided_slice %9 {offsets = [4, 0], sizes = [1, 49], strides = [1, 1]} : vector<8x49xbf16> to vector<1x49xbf16>
    %c4 = arith.constant 4 : index
    %c0_22 = arith.constant 0 : index
    %c0_23 = arith.constant 0 : index
    %32 = vector.load %arg4[%c4, %c0_22, %c0_23] : memref<8x49x128xbf16, #tpu.memory_space<vmem>>, vector<1x49x128xbf16>
    %33 = vector.shape_cast %32 : vector<1x49x128xbf16> to vector<49x128xbf16>
    %cst_24 = arith.constant dense<0.000000e+00> : vector<1x128xf32>
    %34 = tpu.matmul %31, %33, %cst_24 {dimension_numbers = #tpu.dot_dimension_numbers<[1], [0], [0], [1], [0, 0, 1, 1], [], []>} : vector<1x49xbf16>, vector<49x128xbf16>, vector<1x128xf32> -> vector<1x128xf32>
    %35 = arith.addf %30, %34 : vector<1x128xf32>
    %36 = vector.extract_strided_slice %9 {offsets = [5, 0], sizes = [1, 49], strides = [1, 1]} : vector<8x49xbf16> to vector<1x49xbf16>
    %c5 = arith.constant 5 : index
    %c0_25 = arith.constant 0 : index
    %c0_26 = arith.constant 0 : index
    %37 = vector.load %arg4[%c5, %c0_25, %c0_26] : memref<8x49x128xbf16, #tpu.memory_space<vmem>>, vector<1x49x128xbf16>
    %38 = vector.shape_cast %37 : vector<1x49x128xbf16> to vector<49x128xbf16>
    %cst_27 = arith.constant dense<0.000000e+00> : vector<1x128xf32>
    %39 = tpu.matmul %36, %38, %cst_27 {dimension_numbers = #tpu.dot_dimension_numbers<[1], [0], [0], [1], [0, 0, 1, 1], [], []>} : vector<1x49xbf16>, vector<49x128xbf16>, vector<1x128xf32> -> vector<1x128xf32>
    %40 = arith.addf %35, %39 : vector<1x128xf32>
    %41 = vector.extract_strided_slice %9 {offsets = [6, 0], sizes = [1, 49], strides = [1, 1]} : vector<8x49xbf16> to vector<1x49xbf16>
    %c6 = arith.constant 6 : index
    %c0_28 = arith.constant 0 : index
    %c0_29 = arith.constant 0 : index
    %42 = vector.load %arg4[%c6, %c0_28, %c0_29] : memref<8x49x128xbf16, #tpu.memory_space<vmem>>, vector<1x49x128xbf16>
    %43 = vector.shape_cast %42 : vector<1x49x128xbf16> to vector<49x128xbf16>
    %cst_30 = arith.constant dense<0.000000e+00> : vector<1x128xf32>
    %44 = tpu.matmul %41, %43, %cst_30 {dimension_numbers = #tpu.dot_dimension_numbers<[1], [0], [0], [1], [0, 0, 1, 1], [], []>} : vector<1x49xbf16>, vector<49x128xbf16>, vector<1x128xf32> -> vector<1x128xf32>
    %45 = arith.addf %40, %44 : vector<1x128xf32>
    %46 = vector.extract_strided_slice %9 {offsets = [7, 0], sizes = [1, 49], strides = [1, 1]} : vector<8x49xbf16> to vector<1x49xbf16>
    %c7 = arith.constant 7 : index
    %c0_31 = arith.constant 0 : index
    %c0_32 = arith.constant 0 : index
    %47 = vector.load %arg4[%c7, %c0_31, %c0_32] : memref<8x49x128xbf16, #tpu.memory_space<vmem>>, vector<1x49x128xbf16>
    %48 = vector.shape_cast %47 : vector<1x49x128xbf16> to vector<49x128xbf16>
    %cst_33 = arith.constant dense<0.000000e+00> : vector<1x128xf32>
    %49 = tpu.matmul %46, %48, %cst_33 {dimension_numbers = #tpu.dot_dimension_numbers<[1], [0], [0], [1], [0, 0, 1, 1], [], []>} : vector<1x49xbf16>, vector<49x128xbf16>, vector<1x128xf32> -> vector<1x128xf32>
    %50 = arith.addf %45, %49 : vector<1x128xf32>
    %cst_34 = arith.constant 0.000000e+00 : f32
    %51 = vector.broadcast %cst_34 : f32 to vector<1x128xf32>
    %52 = arith.maximumf %50, %51 : vector<1x128xf32>
    %c0_35 = arith.constant 0 : index
    %c0_36 = arith.constant 0 : index
    %53 = vector.load %arg2[%c0_35, %c0_36] : memref<8x36xf32, #tpu.memory_space<vmem>>, vector<8x36xf32>
    %c1_37 = arith.constant 1 : index
    %c0_38 = arith.constant 0 : index
    %c0_39 = arith.constant 0 : index
    %54 = vector.load %arg1[%c1_37, %c0_38, %c0_39] : memref<2x36x49xf32, #tpu.memory_space<vmem>>, vector<1x36x49xf32>
    %55 = vector.shape_cast %54 : vector<1x36x49xf32> to vector<36x49xf32>
    %cst_40 = arith.constant dense<0.000000e+00> : vector<8x49xf32>
    %56 = tpu.matmul %53, %55, %cst_40 {dimension_numbers = #tpu.dot_dimension_numbers<[1], [0], [0], [1], [0, 0, 1, 1], [], []>} : vector<8x36xf32>, vector<36x49xf32>, vector<8x49xf32> -> vector<8x49xf32>
    %c0_41 = arith.constant 0 : index
    %c0_42 = arith.constant 0 : index
    %57 = vector.load %arg3[%c0_41, %c0_42] : memref<8x1xf32, #tpu.memory_space<vmem>>, vector<8x1xf32>
    %58 = vector.broadcast %57 : vector<8x1xf32> to vector<8x49xf32>
    %59 = arith.addf %56, %58 : vector<8x49xf32>
    %cst_43 = arith.constant 0.000000e+00 : f32
    %60 = vector.broadcast %cst_43 : f32 to vector<8x49xf32>
    %61 = arith.maximumf %59, %60 : vector<8x49xf32>
    %62 = arith.truncf %61 : vector<8x49xf32> to vector<8x49xbf16>
    %c0_44 = arith.constant 0 : index
    %c0_45 = arith.constant 0 : index
    %63 = vector.load %arg5[%c0_44, %c0_45] : memref<1x128xf32, #tpu.memory_space<vmem>>, vector<1x128xf32>
    %64 = vector.extract_strided_slice %62 {offsets = [0, 0], sizes = [1, 49], strides = [1, 1]} : vector<8x49xbf16> to vector<1x49xbf16>
    %c0_46 = arith.constant 0 : index
    %c0_47 = arith.constant 0 : index
    %c0_48 = arith.constant 0 : index
    %65 = vector.load %arg4[%c0_46, %c0_47, %c0_48] : memref<8x49x128xbf16, #tpu.memory_space<vmem>>, vector<1x49x128xbf16>
    %66 = vector.shape_cast %65 : vector<1x49x128xbf16> to vector<49x128xbf16>
    %cst_49 = arith.constant dense<0.000000e+00> : vector<1x128xf32>
    %67 = tpu.matmul %64, %66, %cst_49 {dimension_numbers = #tpu.dot_dimension_numbers<[1], [0], [0], [1], [0, 0, 1, 1], [], []>} : vector<1x49xbf16>, vector<49x128xbf16>, vector<1x128xf32> -> vector<1x128xf32>
    %68 = arith.addf %63, %67 : vector<1x128xf32>
    %69 = vector.extract_strided_slice %62 {offsets = [1, 0], sizes = [1, 49], strides = [1, 1]} : vector<8x49xbf16> to vector<1x49xbf16>
    %c1_50 = arith.constant 1 : index
    %c0_51 = arith.constant 0 : index
    %c0_52 = arith.constant 0 : index
    %70 = vector.load %arg4[%c1_50, %c0_51, %c0_52] : memref<8x49x128xbf16, #tpu.memory_space<vmem>>, vector<1x49x128xbf16>
    %71 = vector.shape_cast %70 : vector<1x49x128xbf16> to vector<49x128xbf16>
    %cst_53 = arith.constant dense<0.000000e+00> : vector<1x128xf32>
    %72 = tpu.matmul %69, %71, %cst_53 {dimension_numbers = #tpu.dot_dimension_numbers<[1], [0], [0], [1], [0, 0, 1, 1], [], []>} : vector<1x49xbf16>, vector<49x128xbf16>, vector<1x128xf32> -> vector<1x128xf32>
    %73 = arith.addf %68, %72 : vector<1x128xf32>
    %74 = vector.extract_strided_slice %62 {offsets = [2, 0], sizes = [1, 49], strides = [1, 1]} : vector<8x49xbf16> to vector<1x49xbf16>
    %c2_54 = arith.constant 2 : index
    %c0_55 = arith.constant 0 : index
    %c0_56 = arith.constant 0 : index
    %75 = vector.load %arg4[%c2_54, %c0_55, %c0_56] : memref<8x49x128xbf16, #tpu.memory_space<vmem>>, vector<1x49x128xbf16>
    %76 = vector.shape_cast %75 : vector<1x49x128xbf16> to vector<49x128xbf16>
    %cst_57 = arith.constant dense<0.000000e+00> : vector<1x128xf32>
    %77 = tpu.matmul %74, %76, %cst_57 {dimension_numbers = #tpu.dot_dimension_numbers<[1], [0], [0], [1], [0, 0, 1, 1], [], []>} : vector<1x49xbf16>, vector<49x128xbf16>, vector<1x128xf32> -> vector<1x128xf32>
    %78 = arith.addf %73, %77 : vector<1x128xf32>
    %79 = vector.extract_strided_slice %62 {offsets = [3, 0], sizes = [1, 49], strides = [1, 1]} : vector<8x49xbf16> to vector<1x49xbf16>
    %c3_58 = arith.constant 3 : index
    %c0_59 = arith.constant 0 : index
    %c0_60 = arith.constant 0 : index
    %80 = vector.load %arg4[%c3_58, %c0_59, %c0_60] : memref<8x49x128xbf16, #tpu.memory_space<vmem>>, vector<1x49x128xbf16>
    %81 = vector.shape_cast %80 : vector<1x49x128xbf16> to vector<49x128xbf16>
    %cst_61 = arith.constant dense<0.000000e+00> : vector<1x128xf32>
    %82 = tpu.matmul %79, %81, %cst_61 {dimension_numbers = #tpu.dot_dimension_numbers<[1], [0], [0], [1], [0, 0, 1, 1], [], []>} : vector<1x49xbf16>, vector<49x128xbf16>, vector<1x128xf32> -> vector<1x128xf32>
    %83 = arith.addf %78, %82 : vector<1x128xf32>
    %84 = vector.extract_strided_slice %62 {offsets = [4, 0], sizes = [1, 49], strides = [1, 1]} : vector<8x49xbf16> to vector<1x49xbf16>
    %c4_62 = arith.constant 4 : index
    %c0_63 = arith.constant 0 : index
    %c0_64 = arith.constant 0 : index
    %85 = vector.load %arg4[%c4_62, %c0_63, %c0_64] : memref<8x49x128xbf16, #tpu.memory_space<vmem>>, vector<1x49x128xbf16>
    %86 = vector.shape_cast %85 : vector<1x49x128xbf16> to vector<49x128xbf16>
    %cst_65 = arith.constant dense<0.000000e+00> : vector<1x128xf32>
    %87 = tpu.matmul %84, %86, %cst_65 {dimension_numbers = #tpu.dot_dimension_numbers<[1], [0], [0], [1], [0, 0, 1, 1], [], []>} : vector<1x49xbf16>, vector<49x128xbf16>, vector<1x128xf32> -> vector<1x128xf32>
    %88 = arith.addf %83, %87 : vector<1x128xf32>
    %89 = vector.extract_strided_slice %62 {offsets = [5, 0], sizes = [1, 49], strides = [1, 1]} : vector<8x49xbf16> to vector<1x49xbf16>
    %c5_66 = arith.constant 5 : index
    %c0_67 = arith.constant 0 : index
    %c0_68 = arith.constant 0 : index
    %90 = vector.load %arg4[%c5_66, %c0_67, %c0_68] : memref<8x49x128xbf16, #tpu.memory_space<vmem>>, vector<1x49x128xbf16>
    %91 = vector.shape_cast %90 : vector<1x49x128xbf16> to vector<49x128xbf16>
    %cst_69 = arith.constant dense<0.000000e+00> : vector<1x128xf32>
    %92 = tpu.matmul %89, %91, %cst_69 {dimension_numbers = #tpu.dot_dimension_numbers<[1], [0], [0], [1], [0, 0, 1, 1], [], []>} : vector<1x49xbf16>, vector<49x128xbf16>, vector<1x128xf32> -> vector<1x128xf32>
    %93 = arith.addf %88, %92 : vector<1x128xf32>
    %94 = vector.extract_strided_slice %62 {offsets = [6, 0], sizes = [1, 49], strides = [1, 1]} : vector<8x49xbf16> to vector<1x49xbf16>
    %c6_70 = arith.constant 6 : index
    %c0_71 = arith.constant 0 : index
    %c0_72 = arith.constant 0 : index
    %95 = vector.load %arg4[%c6_70, %c0_71, %c0_72] : memref<8x49x128xbf16, #tpu.memory_space<vmem>>, vector<1x49x128xbf16>
    %96 = vector.shape_cast %95 : vector<1x49x128xbf16> to vector<49x128xbf16>
    %cst_73 = arith.constant dense<0.000000e+00> : vector<1x128xf32>
    %97 = tpu.matmul %94, %96, %cst_73 {dimension_numbers = #tpu.dot_dimension_numbers<[1], [0], [0], [1], [0, 0, 1, 1], [], []>} : vector<1x49xbf16>, vector<49x128xbf16>, vector<1x128xf32> -> vector<1x128xf32>
    %98 = arith.addf %93, %97 : vector<1x128xf32>
    %99 = vector.extract_strided_slice %62 {offsets = [7, 0], sizes = [1, 49], strides = [1, 1]} : vector<8x49xbf16> to vector<1x49xbf16>
    %c7_74 = arith.constant 7 : index
    %c0_75 = arith.constant 0 : index
    %c0_76 = arith.constant 0 : index
    %100 = vector.load %arg4[%c7_74, %c0_75, %c0_76] : memref<8x49x128xbf16, #tpu.memory_space<vmem>>, vector<1x49x128xbf16>
    %101 = vector.shape_cast %100 : vector<1x49x128xbf16> to vector<49x128xbf16>
    %cst_77 = arith.constant dense<0.000000e+00> : vector<1x128xf32>
    %102 = tpu.matmul %99, %101, %cst_77 {dimension_numbers = #tpu.dot_dimension_numbers<[1], [0], [0], [1], [0, 0, 1, 1], [], []>} : vector<1x49xbf16>, vector<49x128xbf16>, vector<1x128xf32> -> vector<1x128xf32>
    %103 = arith.addf %98, %102 : vector<1x128xf32>
    %cst_78 = arith.constant 0.000000e+00 : f32
    %104 = vector.broadcast %cst_78 : f32 to vector<1x128xf32>
    %105 = arith.maximumf %103, %104 : vector<1x128xf32>
    %106 = tpu.concatenate %52, %105 in 0 : vector<1x128xf32>, vector<1x128xf32> -> vector<2x128xf32>
    %107 = arith.truncf %106 : vector<2x128xf32> to vector<2x128xbf16>
    %c0_79 = arith.constant 0 : index
    %c0_80 = arith.constant 0 : index
    %108 = vector.load %arg6[%c0_79, %c0_80] : memref<128x128xbf16, #tpu.memory_space<vmem>>, vector<128x128xbf16>
    %cst_81 = arith.constant dense<0.000000e+00> : vector<2x128xf32>
    %109 = tpu.matmul %107, %108, %cst_81 {dimension_numbers = #tpu.dot_dimension_numbers<[1], [0], [0], [1], [0, 0, 1, 1], [], []>} : vector<2x128xbf16>, vector<128x128xbf16>, vector<2x128xf32> -> vector<2x128xf32>
    %c0_82 = arith.constant 0 : index
    %c0_83 = arith.constant 0 : index
    %110 = vector.load %arg7[%c0_82, %c0_83] : memref<1x128xf32, #tpu.memory_space<vmem>>, vector<1x128xf32>
    %111 = vector.broadcast %110 : vector<1x128xf32> to vector<2x128xf32>
    %112 = arith.addf %109, %111 : vector<2x128xf32>
    %c0_84 = arith.constant 0 : index
    %c0_85 = arith.constant 0 : index
    %113 = vector.load %arg8[%c0_84, %c0_85] : memref<2x128xf32, #tpu.memory_space<vmem>>, vector<2x128xf32>
    tpu.vector_store %arg8[%c0_84, %c0_85], %112 {strides = array<i32>} : memref<2x128xf32, #tpu.memory_space<vmem>>, vector<2x128xf32>,
    return
  }
  func.func @transform_0(%arg0: i32) -> (i32, i32, i32) {
    %c0_i32 = arith.constant 0 : i32
    %c0_i32_0 = arith.constant 0 : i32
    %c0_i32_1 = arith.constant 0 : i32
    return %arg0, %c0_i32, %c0_i32_0 : i32, i32, i32
  }
  func.func @transform_1(%arg0: i32) -> (i32, i32) {
    %c0_i32 = arith.constant 0 : i32
    %c0_i32_0 = arith.constant 0 : i32
    %c0_i32_1 = arith.constant 0 : i32
    return %c0_i32, %c0_i32_0 : i32, i32
  }
  func.func @transform_2(%arg0: i32) -> (i32, i32) {
    %c0_i32 = arith.constant 0 : i32
    %c0_i32_0 = arith.constant 0 : i32
    %c0_i32_1 = arith.constant 0 : i32
    return %c0_i32, %c0_i32_0 : i32, i32
  }
  func.func @transform_3(%arg0: i32) -> (i32, i32, i32) {
    %c0_i32 = arith.constant 0 : i32
    %c0_i32_0 = arith.constant 0 : i32
    %c0_i32_1 = arith.constant 0 : i32
    %c0_i32_2 = arith.constant 0 : i32
    return %c0_i32, %c0_i32_0, %c0_i32_1 : i32, i32, i32
  }
  func.func @transform_4(%arg0: i32) -> (i32, i32) {
    %c0_i32 = arith.constant 0 : i32
    %c0_i32_0 = arith.constant 0 : i32
    %c0_i32_1 = arith.constant 0 : i32
    return %c0_i32, %c0_i32_0 : i32, i32
  }
  func.func @transform_5(%arg0: i32) -> (i32, i32) {
    %c0_i32 = arith.constant 0 : i32
    %c0_i32_0 = arith.constant 0 : i32
    %c0_i32_1 = arith.constant 0 : i32
    return %c0_i32, %c0_i32_0 : i32, i32
  }
  func.func @transform_6(%arg0: i32) -> (i32, i32) {
    %c0_i32 = arith.constant 0 : i32
    %c0_i32_0 = arith.constant 0 : i32
    %c0_i32_1 = arith.constant 0 : i32
    return %c0_i32, %c0_i32_0 : i32, i32
  }
  func.func @transform_7(%arg0: i32) -> (i32, i32) {
    %c0_i32 = arith.constant 0 : i32
    %c0_i32_0 = arith.constant 0 : i32
    return %arg0, %c0_i32 : i32, i32
  }
}

</mosaic_0001>

<bundles_post_ra>
// kernel: net_forward.1
= control target key start
LH: loop header
LB: loop body
LE: loop exit
PB: predicated region body
PF: predicated region fallthrough
CT: control target
= control target key end

     0   :  { %v1913_v3 = vmov 0.0|0.0   ;;  %v1914_v6 = vmov 0.0   ;;  %vm1915_vm0 = vmmov 0   ;;  %v1916_v8 = vmov 0   ;;  %s2302_s0 = inlined_call_operand.vmem [shape: f32[2,36,49], index: 0, kind: input, shape index: {}]   ;;  %s2303_s1 = inlined_call_operand.vmem [shape: f32[8,36], index: 1, kind: input, shape index: {}]   ;;  %s2304_s2 = inlined_call_operand.vmem [shape: f32[8,1], index: 2, kind: input, shape index: {}]   ;;  %s2305_s3 = inlined_call_operand.vmem [shape: bf16[8,49,128], index: 3, kind: input, shape index: {}]   ;;  %s2306_s4 = inlined_call_operand.vmem [shape: f32[1,128], index: 4, kind: input, shape index: {}]   ;;  %s2307_s5 = inlined_call_operand.vmem [shape: bf16[128,128], index: 5, kind: input, shape index: {}]   ;;  %s2308_s6 = inlined_call_operand.vmem [shape: f32[1,128], index: 6, kind: input, shape index: {}]   ;;  %s2309_s7 = inlined_call_operand.hbm [shape: f32[2,128], index: 7, kind: output, shape index: {}]  }
   0x1   :  { %v29_v0 = vld [vmem:[%s2302_s0] sm:$0xff]  ;;  %v30_v1 = vld [vmem:[%s2302_s0 + $0x8] sm:$0xff]  ;;  %v31_v2 = vld [vmem:[%s2302_s0 + $0x10] sm:$0xff]  ;;  %1773 = vmatprep.subr.bf16.mxu0 %v1913_v3  ;;  %1548 = vmatprep.subr.bf16.mxu1 %v1914_v6  ;;  %vm44_vm1 = vcmask 1043456   ;;  %vm40_vm2 = vcmask 293888  }
   0x2   :  { %v1774_v4 = vpack.c.bf16 %v30_v1, %v29_v0  ;;  %v32_v5 = vld [vmem:[%s2302_s0 + $0x18] sm:$0xff]  ;;  %1545 = vmatprep.mubr.msk.f32.mxu0 %vm1915_vm0, %v1914_v6  ;;  %1556 = vmatprep.mubr.msk.bf16.mxu1 %vm1915_vm0, %v1914_v6  ;;  %v34_v9 = vld [vmem:[%s2304_s2] sm:$0xff]  ;;  %v1410_v10 = vld [vmem:[%s2302_s0 + $0x28] sm:$0xff] }
   0x3   :  { %v1777_v7 = vpack.c.bf16 %v32_v5, %v31_v2  ;;  %1848 = vset.pattern.permute.xlu0 %v1916_v8  ;;  %v1849_v11 = vld [vmem:[%s2305_s3] sm:$0xff]   ;;  %v1411_v12 = vld [vmem:[%s2302_s0 + $0x30] sm:$0xff]  ;;  %v1850_v14 = vld [vmem:[%s2305_s3 + $0x8] sm:$0xff]  }
   0x4   :  { %1775 = vmatpush3.bf16.msra.mxu0 %v1774_v4  ;;  %37 = vperm.xlu0 %1848, %v34_v9   ;;  %v33_v13 = vld [vmem:[%s2302_s0 + $0x20] sm:$0xf]  ;;  %v1412_v16 = vld [vmem:[%s2302_s0 + $0x38] sm:$0xff]  ;;  %v1851_v18 = vld [vmem:[%s2305_s3 + $0x10] sm:$0xff]   ;;  %v1780_v19 = vpack.c.bf16 %v1411_v12, %v1410_v10 }
   0x5   :  { %1776 = vmatprep.subr.bf16.mxu0 %v1913_v3  ;;  %1549 = vmatpush3.bf16.msra.mxu1 %v1849_v11  ;;  %v28_v15 = vld [vmem:[%s2303_s1] sm:$0xff]  ;;  %v1414_v21 = vld [vmem:[%s2302_s0 + $0x48] sm:$0xf] }
   0x6   :  { %1550 = vmatprep.subr.bf16.mxu1 %v1914_v6  ;;  %v1413_v17 = vld [vmem:[%s2302_s0 + $0x40] sm:$0xff] }
   0x7   :  { %v1783_v20 = vpack.c.bf16 %v1413_v17, %v1412_v16 }
   0x8   :  { %1778 = vmatpush3.bf16.msra.mxu0 %v1777_v7 }
   0x9   :  { %1543 = vmatprep.subr.mxu0 %v1914_v6  ;;  %1551 = vmatpush3.bf16.msra.mxu1 %v1850_v14 }
   0xa   :  { %1552 = vmatprep.subr.bf16.mxu1 %v1914_v6 }
   0xc   :  { %1544 = vmatpush3.msk.msra.mxu0 %vm44_vm1, %v33_v13 }
   0xd   :  { %1546 = vmatmul.mubr.msk.f32.vlgmr.msra.gmra.mrb[0].mxu0 %vm40_vm2, %v28_v15  ;;  %1779 = vmatprep.subr.bf16.mxu0 %v1913_v3 }
   0xe   :  { %1781 = vmatpush3.bf16.msra.mxu0 %v1780_v19  ;;  %1654 = vmatprep.mubr.msk.f32.mxu0 %vm1915_vm0, %v1914_v6 }
   0xf   :  { %1782 = vmatprep.subr.bf16.mxu0 %v1913_v3  ;;  %1553 = vmatpush3.bf16.msra.mxu1 %v1851_v18 }
  0x10   :  { %1554 = vmatprep.subr.bf16.mxu1 %v1914_v6 }
  0x12   :  { %1784 = vmatpush3.bf16.msra.mxu0 %v1783_v20 }
  0x13   :  { %1652 = vmatprep.subr.mxu0 %v1914_v6 }
  0x16   :  { %1653 = vmatpush3.msk.msra.mxu0 %vm44_vm1, %v1414_v21 }
  0x17   :  { %1655 = vmatmul.mubr.msk.f32.vlgmr.msra.gmra.mrb[2].mxu0 %vm40_vm2, %v28_v15  ;;  %1657 = vmatprep.subr.bf16.mxu0 %v1914_v6 }
  0x18   :  { %1658 = vmatpush3.bf16.msra.mxu0 %v1849_v11  ;;  %1665 = vmatprep.mubr.msk.bf16.mxu0 %vm1915_vm0, %v1914_v6 }
  0x19   :  { %1659 = vmatprep.subr.bf16.mxu0 %v1914_v6 }
  0x1c   :  { %1660 = vmatpush3.bf16.msra.mxu0 %v1850_v14 }
  0x1d   :  { %1661 = vmatprep.subr.bf16.mxu0 %v1914_v6 }
  0x1e   :  { %12 = vsyncpa [#allocation3], 0  ;;  %vm153_vm3 = vcmask 1040384   ;;  %v1852_v23 = vld [vmem:[%s2305_s3 + $0x18] ss:$0 sps:$4 sm:$0x11]  }
  0x1f   :  { %v2026_v22 = vsel %vm153_vm3, 65535, %v1916_v8  ;;  %vm149_vm4 = vcmask 400384   ;;  %v1853_v30 = vld [vmem:[%s2305_s3 + $0x1c] sm:$0xff]   ;;  %v1854_v32 = vld [vmem:[%s2305_s3 + $0x24] sm:$0xff]   ;;  %v1855_v36 = vld [vmem:[%s2305_s3 + $0x2c] sm:$0xff]   ;;  %s1917_s1 = smov [#allocation2]  }
  0x20   :  { %1662 = vmatpush3.bf16.msra.mxu0 %v1851_v18  ;;  %v157_v24 = vand.u32 %v1852_v23, %v2026_v22  ;;  %v1856_v37 = vld [vmem:[%s2305_s3 + $0x34] ss:$0 sps:$4 sm:$0x11]   ;;  %v1857_v41 = vld [vmem:[%s2305_s3 + $0x38] sm:$0xff]   ;;  %v1858_v43 = vld [vmem:[%s2305_s3 + $0x40] sm:$0xff]  }
  0x21   :  { %1663 = vmatprep.subr.bf16.mxu0 %v1914_v6  ;;  %v235_v40 = vand.u32 %v1856_v37, %v2026_v22  ;;  %v1859_v44 = vld [vmem:[%s2305_s3 + $0x48] sm:$0xff]   ;;  %v1860_v45 = vld [vmem:[%s2305_s3 + $0x50] ss:$0 sps:$4 sm:$0x11]   ;;  %v1861_v48 = vld [vmem:[%s2305_s3 + $0x54] sm:$0xff]  }
  0x22   :  { %1555 = vmatpush3.bf16.msra.mxu1 %v157_v24  ;;  %v313_v47 = vand.u32 %v1860_v45, %v2026_v22  ;;  %v1862_v50 = vld [vmem:[%s2305_s3 + $0x5c] sm:$0xff]   ;;  %v1863_v51 = vld [vmem:[%s2305_s3 + $0x64] sm:$0xff]   ;;  %v1864_v52 = vld [vmem:[%s2305_s3 + $0x6c] ss:$0 sps:$4 sm:$0x11]  }
  0x23   :  { %1560 = vmatprep.subr.bf16.mxu1 %v1914_v6  ;;  %v390_v54 = vand.u32 %v1864_v52, %v2026_v22  ;;  %v1865_v55 = vld [vmem:[%s2305_s3 + $0x70] sm:$0xff]   ;;  %v1866_v57 = vld [vmem:[%s2305_s3 + $0x78] sm:$0xff]   ;;  %v1867_v58 = vld [vmem:[%s2305_s3 + $0x80] sm:$0xff]  }
  0x24   :  { %1664 = vmatpush3.bf16.msra.mxu0 %v157_v24  ;;  %v1868_v59 = vld [vmem:[%s2305_s3 + $0x88] ss:$0 sps:$4 sm:$0x11]   ;;  %v1869_v62 = vld [vmem:[%s2305_s3 + $0x8c] sm:$0xff]   ;;  %v1870_v0 = vld [vmem:[%s2305_s3 + $0x94] sm:$0xff]  }
  0x25   :  { %1669 = vmatprep.subr.bf16.mxu0 %v1914_v6  ;;  %v467_v61 = vand.u32 %v1868_v59, %v2026_v22  ;;  %v1871_v1 = vld [vmem:[%s2305_s3 + $0x9c] sm:$0xff]   ;;  %v1872_v2 = vld [vmem:[%s2305_s3 + $0xa4] ss:$0 sps:$4 sm:$0x11]   ;;  %v1873_v5 = vld [vmem:[%s2305_s3 + $0xa8] sm:$0xff]  }
  0x26   :  { %v544_v4 = vand.u32 %v1872_v2, %v2026_v22  ;;  %v1874_v8 = vld [vmem:[%s2305_s3 + $0xb0] sm:$0xff]   ;;  %v1875_v9 = vld [vmem:[%s2305_s3 + $0xb8] sm:$0xff]   ;;  %v1876_v10 = vld [vmem:[%s2305_s3 + $0xc0] ss:$0 sps:$4 sm:$0x11]  }
  0x27   :  { %v621_v12 = vand.u32 %v1876_v10, %v2026_v22  ;;  %v1877_v13 = vld [vmem:[%s2305_s3 + $0xc4] sm:$0xff]   ;;  %v1878_v15 = vld [vmem:[%s2305_s3 + $0xcc] sm:$0xff]   ;;  %v1879_v16 = vld [vmem:[%s2305_s3 + $0xd4] sm:$0xff]  }
  0x28   :  { %v1880_v17 = vld [vmem:[%s2305_s3 + $0xdc] ss:$0 sps:$4 sm:$0x11]   ;;  %v1881_v20 = vld [vmem:[%s2307_s5] sm:$0xff]   ;;  %v1883_v23 = vld [vmem:[%s2307_s5 + $0x10] sm:$0xff]  }
  0x29   :  { %v698_v19 = vand.u32 %v1880_v17, %v2026_v22  ;;  %v1882_v22 = vld [vmem:[%s2307_s5 + $0x8] sm:$0xff]  }
  0x83   :  { %v38_v25 = vpop.permute.xlu0 %37 }
  0xe0   :  { %v114_v26 = vpop.f32.mrb[0].mxu0 }
  0xe1   :  { %v115_v27 = vadd.f32 %v114_v26, %v38_v25  ;;  %v1547_v28 = vpop.f32.mrb[1].mxu0  ;;  %v1885_v26 = vld [vmem:[%s2307_s5 + $0x20] sm:$0xff]  }
  0xe2   :  { %v1887_v28 = vld [vmem:[%s2307_s5 + $0x30] sm:$0xff]  }
  0xe3   :  { %v118_v29 = vmax.f32 %v115_v27, 0.0  ;;  %v1886_v27 = vld [vmem:[%s2307_s5 + $0x28] sm:$0xff]  }
  0xe5   :  { %v2037_v31 = vpack.c.bf16 %v118_v29, %v118_v29  ;;  %v1888_v29 = vld [vmem:[%s2307_s5 + $0x38] sm:$0xff]  }
  0xe7   :  { %1557 = vmatmul.mubr.msk.bf16.vlgmr.msra.gmra.mrb[0].mxu1 %vm149_vm4, %v2037_v31  ;;  %v2067_v42 = vshrl.u32 %v2037_v31, 16  ;;  %v287_v49 = vrot.slane %v2037_v31, 1  ;;  %v441_v63 = vrot.slane %v2037_v31, 2  ;;  %v595_v14 = vrot.slane %v2037_v31, 3 }
  0xe8   :  { %1561 = vmatpush3.bf16.msra.mxu1 %v1853_v30  ;;  %1568 = vmatprep.mubr.msk.bf16.mxu1 %vm1915_vm0, %v1914_v6 }
  0xe9   :  { %1562 = vmatprep.subr.bf16.mxu1 %v1914_v6  ;;  %v364_v56 = vrot.slane %v2067_v42, 1  ;;  %v518_v7 = vrot.slane %v2067_v42, 2  ;;  %v672_v21 = vrot.slane %v2067_v42, 3 }
  0xea   :  { %v817_v33 = vpop.f32.mrb[2].mxu0 }
  0xeb   :  { %v818_v34 = vadd.f32 %v817_v33, %v38_v25  ;;  %v1656_v35 = vpop.f32.mrb[3].mxu0  ;;  %v1884_v25 = vld [vmem:[%s2307_s5 + $0x18] sm:$0xff]  }
  0xec   :  { %1563 = vmatpush3.bf16.msra.mxu1 %v1854_v32 }
  0xed   :  { %v821_v38 = vmax.f32 %v818_v34, 0.0  ;;  %1564 = vmatprep.subr.bf16.mxu1 %v1914_v6  ;;  %v1186_v34 = vlaneseq }
  0xef   :  { %v2054_v39 = vpack.c.bf16 %v821_v38, %v821_v38  ;;  %v1187_v35 = vshrl.u32 %v1186_v34, 7 }
  0xf0   :  { %1565 = vmatpush3.bf16.msra.mxu1 %v1855_v36 }
  0xf1   :  { %1666 = vmatmul.mubr.msk.bf16.vlgmr.msra.gmra.mrb[4].mxu0 %vm149_vm4, %v2054_v39  ;;  %1566 = vmatprep.subr.bf16.mxu1 %v1914_v6  ;;  %v2088_v46 = vshrl.u32 %v2054_v39, 16  ;;  %v914_v53 = vrot.slane %v2054_v39, 1  ;;  %v1004_v3 = vrot.slane %v2054_v39, 2  ;;  %v1094_v18 = vrot.slane %v2054_v39, 3 }
  0xf2   :  { %1670 = vmatpush3.bf16.msra.mxu0 %v1853_v30  ;;  %1677 = vmatprep.mubr.msk.bf16.mxu0 %vm1915_vm0, %v1914_v6 }
  0xf3   :  { %1671 = vmatprep.subr.bf16.mxu0 %v1914_v6  ;;  %v959_v60 = vrot.slane %v2088_v46, 1  ;;  %v1049_v11 = vrot.slane %v2088_v46, 2  ;;  %v1139_v24 = vrot.slane %v2088_v46, 3 }
  0xf4   :  { %1567 = vmatpush3.bf16.msra.mxu1 %v235_v40 }
  0xf5   :  { %1572 = vmatprep.subr.bf16.mxu1 %v1914_v6 }
  0xf6   :  { %1672 = vmatpush3.bf16.msra.mxu0 %v1854_v32 }
  0xf7   :  { %1569 = vmatmul.mubr.msk.bf16.vlgmr.msra.gmra.mrb[0].mxu1 %vm149_vm4, %v2067_v42  ;;  %1673 = vmatprep.subr.bf16.mxu0 %v1914_v6 }
  0xf8   :  { %1573 = vmatpush3.bf16.msra.mxu1 %v1857_v41  ;;  %1580 = vmatprep.mubr.msk.bf16.mxu1 %vm1915_vm0, %v1914_v6 }
  0xf9   :  { %1574 = vmatprep.subr.bf16.mxu1 %v1914_v6 }
  0xfa   :  { %1674 = vmatpush3.bf16.msra.mxu0 %v1855_v36  ;;  %v120_v36 = vld [vmem:[%s2306_s4] sm:$0x1]  ;;  %s1311_s4 = sshll.u32 %s1917_s1, 4  ;;  %s1312_s4 = int_to_ptr.vmem [resolvable:$true] %s1311_s4 }
  0xfb   :  { %1675 = vmatprep.subr.bf16.mxu0 %v1914_v6  ;;  %s1889_s28 = scalar_lea.vmem %s1312_s4, 32  ;;  %p1894_p1 = scmp.lt.s32.totalorder %s1312_s4, %s1312_s4 }
  0xfc   :  { %1575 = vmatpush3.bf16.msra.mxu1 %v1858_v43  ;;  %p1890_p0 = scmp.ne.s32.totalorder %s1312_s4, %s1889_s28  ;;  %p1895_p2 = scmp.lt.s32.totalorder %s1889_s28, %s1889_s28 }
  0xfd   :  { %1576 = vmatprep.subr.bf16.mxu1 %v1914_v6 }
  0xfe   :  { %1676 = vmatpush3.bf16.msra.mxu0 %v235_v40  ;;  %v1188_v40 = vsub.s32 0, %v1187_v35  ;;  %p1896_p3 = por %p1895_p2, %p1894_p1 }
  0xff   :  { %1681 = vmatprep.subr.bf16.mxu0 %v1914_v6 }
 0x100   :  { %1577 = vmatpush3.bf16.msra.mxu1 %v1859_v44  ;;  %p1897_p4 = pnand %p1896_p3, %p1890_p0 }
 0x101   :  { %1678 = vmatmul.mubr.msk.bf16.vlgmr.msra.gmra.mrb[4].mxu0 %vm149_vm4, %v2088_v46  ;;  %1578 = vmatprep.subr.bf16.mxu1 %v1914_v6 }
 0x102   :  { %1682 = vmatpush3.bf16.msra.mxu0 %v1857_v41  ;;  %1689 = vmatprep.mubr.msk.bf16.mxu0 %vm1915_vm0, %v1914_v6 }
 0x103   :  { %1683 = vmatprep.subr.bf16.mxu0 %v1914_v6 }
 0x104   :  { %1579 = vmatpush3.bf16.msra.mxu1 %v313_v47 }
 0x105   :  { %1584 = vmatprep.subr.bf16.mxu1 %v1914_v6 }
 0x106   :  { %1684 = vmatpush3.bf16.msra.mxu0 %v1858_v43 }
 0x107   :  { %1581 = vmatmul.mubr.msk.bf16.vlgmr.msra.gmra.mrb[0].mxu1 %vm149_vm4, %v287_v49  ;;  %1685 = vmatprep.subr.bf16.mxu0 %v1914_v6 }
 0x108   :  { %1585 = vmatpush3.bf16.msra.mxu1 %v1861_v48  ;;  %1592 = vmatprep.mubr.msk.bf16.mxu1 %vm1915_vm0, %v1914_v6 }
 0x109   :  { %1586 = vmatprep.subr.bf16.mxu1 %v1914_v6 }
 0x10a   :  { %1686 = vmatpush3.bf16.msra.mxu0 %v1859_v44 }
 0x10b   :  { %1687 = vmatprep.subr.bf16.mxu0 %v1914_v6 }
 0x10c   :  { %1587 = vmatpush3.bf16.msra.mxu1 %v1862_v50 }
 0x10d   :  { %1588 = vmatprep.subr.bf16.mxu1 %v1914_v6 }
 0x10e   :  { %1688 = vmatpush3.bf16.msra.mxu0 %v313_v47 }
 0x10f   :  { %1693 = vmatprep.subr.bf16.mxu0 %v1914_v6 }
 0x110   :  { %1589 = vmatpush3.bf16.msra.mxu1 %v1863_v51 }
 0x111   :  { %1690 = vmatmul.mubr.msk.bf16.vlgmr.msra.gmra.mrb[4].mxu0 %vm149_vm4, %v914_v53  ;;  %1590 = vmatprep.subr.bf16.mxu1 %v1914_v6 }
 0x112   :  { %1694 = vmatpush3.bf16.msra.mxu0 %v1861_v48  ;;  %1701 = vmatprep.mubr.msk.bf16.mxu0 %vm1915_vm0, %v1914_v6  ;;  %v1425_v48 = vld [vmem:[%s2308_s6] ss:$0 sm:$0xff] }
 0x113   :  { %1695 = vmatprep.subr.bf16.mxu0 %v1914_v6 }
 0x114   :  { %1591 = vmatpush3.bf16.msra.mxu1 %v390_v54 }
 0x115   :  { %1596 = vmatprep.subr.bf16.mxu1 %v1914_v6 }
 0x116   :  { %1696 = vmatpush3.bf16.msra.mxu0 %v1862_v50 }
 0x117   :  { %1593 = vmatmul.mubr.msk.bf16.vlgmr.msra.gmra.mrb[0].mxu1 %vm149_vm4, %v364_v56  ;;  %1697 = vmatprep.subr.bf16.mxu0 %v1914_v6 }
 0x118   :  { %1597 = vmatpush3.bf16.msra.mxu1 %v1865_v55  ;;  %1604 = vmatprep.mubr.msk.bf16.mxu1 %vm1915_vm0, %v1914_v6 }
 0x119   :  { %1598 = vmatprep.subr.bf16.mxu1 %v1914_v6 }
 0x11a   :  { %1698 = vmatpush3.bf16.msra.mxu0 %v1863_v51 }
 0x11b   :  { %1699 = vmatprep.subr.bf16.mxu0 %v1914_v6 }
 0x11c   :  { %1599 = vmatpush3.bf16.msra.mxu1 %v1866_v57 }
 0x11d   :  { %1600 = vmatprep.subr.bf16.mxu1 %v1914_v6 }
 0x11e   :  { %1700 = vmatpush3.bf16.msra.mxu0 %v390_v54 }
 0x11f   :  { %1705 = vmatprep.subr.bf16.mxu0 %v1914_v6 }
 0x120   :  { %1601 = vmatpush3.bf16.msra.mxu1 %v1867_v58 }
 0x121   :  { %1702 = vmatmul.mubr.msk.bf16.vlgmr.msra.gmra.mrb[4].mxu0 %vm149_vm4, %v959_v60  ;;  %1602 = vmatprep.subr.bf16.mxu1 %v1914_v6 }
 0x122   :  { %1706 = vmatpush3.bf16.msra.mxu0 %v1865_v55  ;;  %1713 = vmatprep.mubr.msk.bf16.mxu0 %vm1915_vm0, %v1914_v6 }
 0x123   :  { %1707 = vmatprep.subr.bf16.mxu0 %v1914_v6 }
 0x124   :  { %1603 = vmatpush3.bf16.msra.mxu1 %v467_v61 }
 0x125   :  { %1608 = vmatprep.subr.bf16.mxu1 %v1914_v6 }
 0x126   :  { %1708 = vmatpush3.bf16.msra.mxu0 %v1866_v57 }
 0x127   :  { %1605 = vmatmul.mubr.msk.bf16.vlgmr.msra.gmra.mrb[0].mxu1 %vm149_vm4, %v441_v63  ;;  %1709 = vmatprep.subr.bf16.mxu0 %v1914_v6 }
 0x128   :  { %1609 = vmatpush3.bf16.msra.mxu1 %v1869_v62  ;;  %1616 = vmatprep.mubr.msk.bf16.mxu1 %vm1915_vm0, %v1914_v6 }
 0x129   :  { %1610 = vmatprep.subr.bf16.mxu1 %v1914_v6 }
 0x12a   :  { %1710 = vmatpush3.bf16.msra.mxu0 %v1867_v58 }
 0x12b   :  { %1711 = vmatprep.subr.bf16.mxu0 %v1914_v6 }
 0x12c   :  { %1611 = vmatpush3.bf16.msra.mxu1 %v1870_v0 }
 0x12d   :  { %1612 = vmatprep.subr.bf16.mxu1 %v1914_v6 }
 0x12e   :  { %1712 = vmatpush3.bf16.msra.mxu0 %v467_v61 }
 0x12f   :  { %1717 = vmatprep.subr.bf16.mxu0 %v1914_v6 }
 0x130   :  { %1613 = vmatpush3.bf16.msra.mxu1 %v1871_v1 }
 0x131   :  { %1714 = vmatmul.mubr.msk.bf16.vlgmr.msra.gmra.mrb[4].mxu0 %vm149_vm4, %v1004_v3  ;;  %1614 = vmatprep.subr.bf16.mxu1 %v1914_v6 }
 0x132   :  { %1718 = vmatpush3.bf16.msra.mxu0 %v1869_v62  ;;  %1725 = vmatprep.mubr.msk.bf16.mxu0 %vm1915_vm0, %v1914_v6 }
 0x133   :  { %1719 = vmatprep.subr.bf16.mxu0 %v1914_v6 }
 0x134   :  { %1615 = vmatpush3.bf16.msra.mxu1 %v544_v4 }
 0x135   :  { %1620 = vmatprep.subr.bf16.mxu1 %v1914_v6 }
 0x136   :  { %1720 = vmatpush3.bf16.msra.mxu0 %v1870_v0 }
 0x137   :  { %1617 = vmatmul.mubr.msk.bf16.vlgmr.msra.gmra.mrb[0].mxu1 %vm149_vm4, %v518_v7  ;;  %1721 = vmatprep.subr.bf16.mxu0 %v1914_v6 }
 0x138   :  { %1621 = vmatpush3.bf16.msra.mxu1 %v1873_v5  ;;  %1628 = vmatprep.mubr.msk.bf16.mxu1 %vm1915_vm0, %v1914_v6 }
 0x139   :  { %1622 = vmatprep.subr.bf16.mxu1 %v1914_v6 }
 0x13a   :  { %1722 = vmatpush3.bf16.msra.mxu0 %v1871_v1 }
 0x13b   :  { %1723 = vmatprep.subr.bf16.mxu0 %v1914_v6 }
 0x13c   :  { %1623 = vmatpush3.bf16.msra.mxu1 %v1874_v8 }
 0x13d   :  { %1624 = vmatprep.subr.bf16.mxu1 %v1914_v6 }
 0x13e   :  { %1724 = vmatpush3.bf16.msra.mxu0 %v544_v4 }
 0x13f   :  { %1729 = vmatprep.subr.bf16.mxu0 %v1914_v6 }
 0x140   :  { %1625 = vmatpush3.bf16.msra.mxu1 %v1875_v9 }
 0x141   :  { %1726 = vmatmul.mubr.msk.bf16.vlgmr.msra.gmra.mrb[4].mxu0 %vm149_vm4, %v1049_v11  ;;  %1626 = vmatprep.subr.bf16.mxu1 %v1914_v6 }
 0x142   :  { %1730 = vmatpush3.bf16.msra.mxu0 %v1873_v5  ;;  %1737 = vmatprep.mubr.msk.bf16.mxu0 %vm1915_vm0, %v1914_v6 }
 0x143   :  { %1731 = vmatprep.subr.bf16.mxu0 %v1914_v6 }
 0x144   :  { %1627 = vmatpush3.bf16.msra.mxu1 %v621_v12 }
 0x145   :  { %1632 = vmatprep.subr.bf16.mxu1 %v1914_v6 }
 0x146   :  { %1732 = vmatpush3.bf16.msra.mxu0 %v1874_v8 }
 0x147   :  { %1629 = vmatmul.mubr.msk.bf16.vlgmr.msra.gmra.mrb[0].mxu1 %vm149_vm4, %v595_v14  ;;  %1733 = vmatprep.subr.bf16.mxu0 %v1914_v6 }
 0x148   :  { %1633 = vmatpush3.bf16.msra.mxu1 %v1877_v13  ;;  %1640 = vmatprep.mubr.msk.bf16.mxu1 %vm1915_vm0, %v1914_v6 }
 0x149   :  { %1634 = vmatprep.subr.bf16.mxu1 %v1914_v6 }
 0x14a   :  { %1734 = vmatpush3.bf16.msra.mxu0 %v1875_v9 }
 0x14b   :  { %1735 = vmatprep.subr.bf16.mxu0 %v1914_v6 }
 0x14c   :  { %1635 = vmatpush3.bf16.msra.mxu1 %v1878_v15 }
 0x14d   :  { %1636 = vmatprep.subr.bf16.mxu1 %v1914_v6 }
 0x14e   :  { %1736 = vmatpush3.bf16.msra.mxu0 %v621_v12 }
 0x14f   :  { %1741 = vmatprep.subr.bf16.mxu0 %v1914_v6 }
 0x150   :  { %1637 = vmatpush3.bf16.msra.mxu1 %v1879_v16 }
 0x151   :  { %1738 = vmatmul.mubr.msk.bf16.vlgmr.msra.gmra.mrb[4].mxu0 %vm149_vm4, %v1094_v18  ;;  %1638 = vmatprep.subr.bf16.mxu1 %v1914_v6 }
 0x152   :  { %1742 = vmatpush3.bf16.msra.mxu0 %v1877_v13  ;;  %1749 = vmatprep.mubr.msk.bf16.mxu0 %vm1915_vm0, %v1914_v6 }
 0x153   :  { %1743 = vmatprep.subr.bf16.mxu0 %v1914_v6 }
 0x154   :  { %1639 = vmatpush3.bf16.msra.mxu1 %v698_v19 }
 0x155   :  { %1753 = vmatprep.subr.bf16.mxu1 %v1914_v6 }
 0x156   :  { %1744 = vmatpush3.bf16.msra.mxu0 %v1878_v15 }
 0x157   :  { %1641 = vmatmul.mubr.msk.bf16.vlgmr.msra.gmra.mrb[0].mxu1 %vm149_vm4, %v672_v21  ;;  %1745 = vmatprep.subr.bf16.mxu0 %v1914_v6 }
 0x158   :  { %1754 = vmatpush3.bf16.msra.mxu1 %v1881_v20  ;;  %1769 = vmatprep.mubr.msk.bf16.mxu1 %vm1915_vm0, %v1914_v6 }
 0x159   :  { %1755 = vmatprep.subr.bf16.mxu1 %v1914_v6 }
 0x15a   :  { %1746 = vmatpush3.bf16.msra.mxu0 %v1879_v16 }
 0x15b   :  { %1747 = vmatprep.subr.bf16.mxu0 %v1914_v6 }
 0x15c   :  { %1756 = vmatpush3.bf16.msra.mxu1 %v1882_v22 }
 0x15d   :  { %1757 = vmatprep.subr.bf16.mxu1 %v1914_v6 }
 0x15e   :  { %1748 = vmatpush3.bf16.msra.mxu0 %v698_v19 }
 0x160   :  { %1758 = vmatpush3.bf16.msra.mxu1 %v1883_v23 }
 0x161   :  { %1750 = vmatmul.mubr.msk.bf16.vlgmr.msra.gmra.mrb[4].mxu0 %vm149_vm4, %v1139_v24  ;;  %1759 = vmatprep.subr.bf16.mxu1 %v1914_v6 }
 0x164   :  { %1760 = vmatpush3.bf16.msra.mxu1 %v1884_v25 }
 0x165   :  { %1761 = vmatprep.subr.bf16.mxu1 %v1914_v6 }
 0x168   :  { %1762 = vmatpush3.bf16.msra.mxu1 %v1885_v26 }
 0x169   :  { %1763 = vmatprep.subr.bf16.mxu1 %v1914_v6 }
 0x16c   :  { %1764 = vmatpush3.bf16.msra.mxu1 %v1886_v27 }
 0x16d   :  { %1765 = vmatprep.subr.bf16.mxu1 %v1914_v6 }
 0x170   :  { %1766 = vmatpush3.bf16.msra.mxu1 %v1887_v28 }
 0x171   :  { %1767 = vmatprep.subr.bf16.mxu1 %v1914_v6 }
 0x174   :  { %1768 = vmatpush3.bf16.msra.mxu1 %v1888_v29 }
 0x22a   :  { %v734_v30 = vpop.f32.mrb[0].mxu1 }
 0x22b   :  { %v1642_v31 = vpop.f32.mrb[1].mxu1  ;;  %v1785_v38 = vadd.f32 %v734_v30, %v120_v36 }
 0x22c   :  { %v737_v32 = vpop.f32.mrb[2].mxu1 }
 0x22d   :  { %v1643_v33 = vpop.f32.mrb[3].mxu1  ;;  %v741_v44 = vmax.f32 %v1785_v38, 0.0 }
 0x234   :  { %v1177_v37 = vpop.f32.mrb[4].mxu0 }
 0x235   :  { %v1786_v39 = vadd.f32 %v1177_v37, %v120_v36  ;;  %v1751_v6 = vpop.f32.mrb[5].mxu0 }
 0x236   :  { %v1180_v41 = vpop.f32.mrb[6].mxu0 }
 0x237   :  { %v1184_v42 = vmax.f32 %v1786_v39, 0.0  ;;  %v1752_v43 = vpop.f32.mrb[7].mxu0 }
 0x239   :  { %v1189_v45 = vrot.slane %v1184_v42, %v1188_v40 }
 0x23b   :  { %v1191_v46 = vsel %vm153_vm3, %v741_v44, %v1189_v45 }
 0x23c   :  { %v1192_v47 = vpack.c.bf16 %v1191_v46, %v1191_v46 }
 0x23e   :  { %1770 = vmatmul.mubr.bf16.vlgmr.msra.gmra.mrb[4].mxu1 %v1192_v47 }
 0x311   :  { %v1298_v49 = vpop.f32.mrb[4].mxu1 }
 0x312   :  { %v1299_v50 = vadd.f32 %v1425_v48, %v1298_v49  ;;  %v1771_v51 = vpop.f32.mrb[5].mxu1 }
 0x313   :  { %v1301_v52 = vpop.f32.mrb[6].mxu1 }
 0x314   :  { %1304 = vst [vmem:[#allocation2] sm:$0x3] %v1299_v50  ;;  %v1772_v53 = vpop.f32.mrb[7].mxu1 }
 0x315   :  { %1900 = shalt.err (!%p1897_p4)
}
 0x316   :  { %s1901_s6 = scalar_lea.hbm %s2309_s7, 32 }
 0x317   :  { %p1902_p5 = scmp.ne.s32.totalorder %s2309_s7, %s1901_s6  ;;  %p1905_p6 = scmp.lt.u32.totalorder %s1901_s6, %s2309_s7 }
 0x319   :  { %p1907_p7 = pnand %p1905_p6, %p1902_p5 }
 0x31b   :  { %1910 = shalt.err (!%p1907_p7)
}
 0x31c   :  { %1314 = dma.vmem_to_hbm [thread:$0]  %s1312_s4, 32, %s2309_s7, [#allocation3]  }
 0x31d   :  { %1911 = dma.done.wait [#allocation3], 32  }
 0x31e   :  { %1912 = vsyncadd [#allocation3], 4294967264 }
 0x31f   :  { %1318 = vsyncpa [#allocation3], 1 }

</bundles_post_ra>
